<compile_context>
chip_gen: v5e
topology: v5e:2x2
jax: 0.10.0
libtpu: 0.0.40
codegen_flags: <defaults>
</compile_context>

<pallas_src>
import math
import functools

import jax
import jax.numpy as jnp
from jax.experimental import pallas as pl
from jax.experimental.pallas import tpu as pltpu


# ----------------------------- Pallas kernel -------------------------------

def _pma_kernel(x_ref, wp_ref, qf_ref, wo_ref, bo_ref, o_ref, acc_ref, *, b_sub):
    """One grid step = a block of Bt dense batches, processed b_sub at a time.

    x_ref : [Bt, L, D+1]  padded keys + trailing "is-padding" indicator column
    wp_ref: [D+1, 2*S*D]  fused projection [ Wv tiled over seeds | Wk folded with
                          seeds ]; indicator row = [0 | -1e30] so padded keys
                          score -1e30 (bf16 or f32)
    qf_ref: [1, S*D]      projected seeds q = S@Wq+bq (+ folded bv), f32
    wo_ref: [S*D, S*D]    block-diag(Wo): per-seed fc_o as one lane-dense matmul
    bo_ref: [1, S*D]      fc_o bias tiled over seeds, f32
    o_ref : [Bt, S*D]     lane-dense output (seeds folded into lanes), f32
    acc_ref: VMEM [Bt, S*D] f32 scratch holding the pre-fc_o result
    """
    Bt, L, Daug = x_ref.shape
    SD = o_ref.shape[-1]
    n_sub = Bt // b_sub
    qf = qf_ref[...]                          # hoisted broadcast (once per step)

    def sub_body(sb):
        off = sb * b_sub
        if not isinstance(off, int):
            off = pl.multiple_of(off, b_sub)
        # One MXU matmul per sub-block: [b_sub*L, D+1] x [D+1, 2*S*D], bf16 in,
        # f32 accumulate.  No bias add (biases folded away in the wrapper).
        x2 = x_ref[pl.ds(off, b_sub)].reshape(b_sub * L, Daug)
        proj = jnp.dot(x2, wp_ref[...], preferred_element_type=jnp.float32)
        v = proj[:, :SD].reshape(b_sub, L, SD)    # values tiled over seeds
        e = proj[:, SD:].reshape(b_sub, L, SD)    # scaled q_h.k_h; padded = -1e30
        # Masked softmax over keys (axis=1): padded-key scores are -1e30, so
        # exp(e - max) underflows to exactly 0 -- no mask / compare / select.
        m = jnp.max(e, axis=1, keepdims=True)
        p = jnp.exp(e - m)
        denom = jnp.sum(p, axis=1)                # [b_sub, SD], >= 1 (no 0/0 guard)
        wsum = jnp.sum(p * v, axis=1)             # weighted value sum (un-normalized)
        # Normalize after the key reduction (L x fewer multiplies than alpha*v),
        # EUP approximate reciprocal, + q residual (with bv folded in).
        acc_ref[pl.ds(off, b_sub), :] = wsum * pl.reciprocal(denom, approx=True) + qf

    if n_sub <= 8:                # short, static trip count -> inline
        for sb in range(n_sub):
            sub_body(sb)
    else:                         # large blocks -> rolled loop, bounded live ranges
        def fori_body(sb, carry):
            sub_body(sb)
            return carry
        jax.lax.fori_loop(0, n_sub, fori_body, 0)

    # out = out + relu(fc_o(out)) via one block-diagonal, lane-dense matmul over
    # the whole batch block (M = Bt rows on the MXU).
    out = acc_ref[...]
    ff = jnp.dot(out.astype(wo_ref.dtype), wo_ref[...],
                 preferred_element_type=jnp.float32) + bo_ref[...]
    o_ref[...] = (out + jnp.maximum(ff, 0.0)).astype(o_ref.dtype)


# ----------------------------- JAX glue -------------------------------------

def to_dense_batch(x, batch, batch_size, max_len):
    """torch_geometric.utils.to_dense_batch for sorted `batch` (static sizes).

    Caller contract (same as torch_geometric): `batch` is sorted and
    max_len >= the true maximum per-graph length.
    """
    n = x.shape[0]
    counts = jnp.bincount(batch, length=batch_size)
    starts = jnp.concatenate([jnp.zeros((1,), counts.dtype), jnp.cumsum(counts)[:-1]])
    pos = jnp.arange(n) - starts[batch]
    x_dense = jnp.zeros((batch_size, max_len, x.shape[1]), x.dtype).at[batch, pos].set(x)
    mask = jnp.zeros((batch_size, max_len), jnp.float32).at[batch, pos].set(1.0)
    return x_dense, mask


def _round_up(a, b):
    return (a + b - 1) // b * b


def _choose_b_tile(batch_size, L, elem_bytes, b_sub, requested, vmem_budget_bytes):
    """Pick batches-per-grid-step.

    v5e : default ~12 MiB x-stream budget stays under the 16 MiB scoped default.
    v6e : same budget is conservative (128 MiB VMEM); raise vmem_budget_bytes.
    v7x : 64 MiB physical VMEM -> keep the default budget and keep grid >= 2
          (enforced below when the batch is large enough) so both TCs get work.
    """
    bpad = _round_up(max(batch_size, 1), b_sub)
    if requested is not None:
        return max(b_sub, min(_round_up(requested, b_sub), bpad))
    # Per-batch VMEM of the streamed tensors: double-buffered x (lane dim pads to
    # 128 in VMEM), double-buffered f32 output block, f32 accumulator scratch.
    per_batch = 2 * L * 128 * elem_bytes + 2 * 128 * 4 + 128 * 4
    bt = (vmem_budget_bytes // per_batch) // b_sub * b_sub
    bt = max(b_sub, min(bt, 256))                 # 64-256 is the sweet spot
    bt = min(bt, bpad)
    if bpad >= 2 * b_sub:                         # >= 2 grid steps (v7x: 2 TCs/chip)
        bt = min(bt, _round_up((bpad + 1) // 2, b_sub))
    return max(bt, b_sub)


def pma_forward(x, batch, params, *, dim, num_heads, num_seeds,
                batch_size, max_len, b_tile=None, b_sub=8,
                param_dtype=jnp.bfloat16, vmem_budget_bytes=12 << 20,
                flatten_output=True):
    """PMA forward. batch_size / max_len (and tiling knobs) are static ints.

    param_dtype: storage dtype for x / Wp / Wo_bd fed to the MXU (bf16 default,
    f32 accumulation always); pass jnp.float32 for bit-closer results.
    """
    assert dim % num_heads == 0
    dim_head = dim // num_heads
    SD = num_seeds * dim
    S_, Wq, bq, Wk, bk, Wv, bv, Wo, bo = params

    b_sub = _round_up(max(b_sub, 8), 8)
    eb = jnp.dtype(param_dtype).itemsize
    L = _round_up(max_len, 8)                       # sublane multiple
    b_tile = _choose_b_tile(batch_size, L, eb, b_sub, b_tile, vmem_budget_bytes)
    Bpad = _round_up(_round_up(batch_size, b_sub), b_tile)
    Daug = dim + 1

    # ---- dense batching + "is-padding" indicator column ----------------------
    x_dense, mask = to_dense_batch(x, batch, batch_size, max_len)
    x_dense = jnp.pad(x_dense, ((0, Bpad - batch_size), (0, L - max_len), (0, 0)))
    mask = jnp.pad(mask, ((0, Bpad - batch_size), (0, L - max_len)))
    # Indicator = 1.0 exactly on padded key slots, 0.0 on valid ones.  The fused
    # projection maps it to a -1e30 score, replacing the [B, L, 1] mask stream.
    x_aug = jnp.concatenate([x_dense, (1.0 - mask)[..., None]], axis=-1)
    x_aug = x_aug.astype(param_dtype)

    # ---- batch-invariant precompute (hoisted out of the kernel) --------------
    q = S_ @ Wq + bq                                # [S, D] projected seeds (shared)
    scale = 1.0 / math.sqrt(dim_head)
    # Output lane e = s*dim + d  (seed s, feature d, head h = d // dim_head):
    #   score lane e = scale * <x@Wk, q[s] masked to head h>   (Wk folded with
    #                  seeds; the bk term is constant over keys -> softmax
    #                  invariant, so it is dropped)
    #   value lane e = v[., d]  (Wv tiled over seeds; bv passes through softmax
    #                  because sum_l alpha_l = 1, so it is folded into q below)
    e_idx = jnp.arange(SD)
    seed_of_e = e_idx // dim
    head_of_e = (e_idx % dim) // dim_head
    head_of_d = jnp.arange(dim) // dim_head
    q_sc = q[seed_of_e] * (head_of_e[:, None] == head_of_d[None, :])   # [SD, D]
    We_big = scale * (Wk @ q_sc.T)                  # [D, SD]
    Wv_big = jnp.tile(Wv, (1, num_seeds))           # [D, SD]
    ind_row = jnp.concatenate([jnp.zeros((1, SD), jnp.float32),
                               jnp.full((1, SD), -1e30, jnp.float32)], axis=1)
    Wp = jnp.concatenate(
        [jnp.concatenate([Wv_big, We_big], axis=1), ind_row], axis=0)  # [D+1, 2*SD]
    Wp = Wp.astype(param_dtype)
    qf = (q.reshape(1, SD) + jnp.tile(bv, num_seeds)[None, :]).astype(jnp.float32)
    Wo_bd = jnp.kron(jnp.eye(num_seeds, dtype=Wo.dtype), Wo).astype(param_dtype)
    bo_flat = jnp.tile(bo, num_seeds)[None, :].astype(jnp.float32)

    # ---- explicit VMEM sizing -------------------------------------------------
    est = (2 * b_tile * L * 128 * eb                       # x blocks (double-buffered)
           + 2 * b_tile * max(SD, 128) * 4                 # output blocks
           + b_tile * max(SD, 128) * 4                     # accumulator scratch
           + 2 * (_round_up(Daug, 8) * _round_up(2 * SD, 128) * eb
                  + max(SD, 128) * max(SD, 128) * eb
                  + 2 * 8 * 128 * 4)                       # weights / biases
           + 8 * b_sub * L * max(2 * SD, 256) * 4)         # per-sub-block intermediates
    vmem_limit = int(min(32 << 20, max(16 << 20, est + (4 << 20))))

    cost = pl.CostEstimate(
        flops=int(2 * Bpad * L * Daug * (2 * SD) + 2 * Bpad * SD * SD
                  + 8 * Bpad * L * SD),
        transcendentals=int(Bpad * L * SD + Bpad * SD),
        bytes_accessed=int(x_aug.size * eb + Wp.size * eb + Wo_bd.size * eb
                           + (qf.size + bo_flat.size + Bpad * SD) * 4),
    )

    rep2 = lambda b: (0, 0)                         # replicated 2-D operands

    out = pl.pallas_call(
        functools.partial(_pma_kernel, b_sub=b_sub),
        out_shape=jax.ShapeDtypeStruct((Bpad, SD), jnp.float32),
        grid_spec=pltpu.PrefetchScalarGridSpec(
            num_scalar_prefetch=0,
            grid=(Bpad // b_tile,),
            in_specs=[
                pl.BlockSpec((b_tile, L, Daug), lambda b: (b, 0, 0)),   # x (+indicator)
                pl.BlockSpec((Daug, 2 * SD), rep2),                     # fused Wp
                pl.BlockSpec((1, SD), rep2),                            # q (+ folded bv)
                pl.BlockSpec((SD, SD), rep2),                           # block-diag Wo
                pl.BlockSpec((1, SD), rep2),                            # bo tiled
            ],
            out_specs=pl.BlockSpec((b_tile, SD), lambda b: (b, 0)),     # lane-dense out
            scratch_shapes=[pltpu.VMEM((b_tile, SD), jnp.float32)],
        ),
        compiler_params=pltpu.CompilerParams(
            dimension_semantics=("parallel",),
            vmem_limit_bytes=vmem_limit),
        cost_estimate=cost,
    )(x_aug, Wp, qf, Wo_bd, bo_flat)

    out = out[:batch_size]
    if flatten_output:
        # Matches the module's [batch_size*num_seeds, dim]; this splits the
        # 128-lane output into 32-lane rows (an XLA relayout outside the kernel).
        # Pass flatten_output=False to keep the lane-dense [B, S*D] form.
        return out.reshape(batch_size * num_seeds, dim)
    return out


# ----------------------------- pure-JAX reference ----------------------------

def pma_reference(x, batch, params, *, dim, num_heads, num_seeds, batch_size, max_len):
    dim_head = dim // num_heads
    S_, Wq, bq, Wk, bk, Wv, bv, Wo, bo = params
    x_dense, mask = to_dense_batch(x, batch, batch_size, max_len)
    q = jnp.broadcast_to(S_ @ Wq + bq, (batch_size, num_seeds, dim))
    k = x_dense @ Wk + bk
    v = x_dense @ Wv + bv
    qh = q.reshape(batch_size, num_seeds, num_heads, dim_head)
    kh = k.reshape(batch_size, -1, num_heads, dim_head)
    vh = v.reshape(batch_size, -1, num_heads, dim_head)
    e = jnp.einsum('bxhd,byhd->bhxy', qh, kh) / math.sqrt(dim_head)
    m = mask[:, None, None, :] > 0
    e = jnp.where(m, e, -1e30)
    alpha = jax.nn.softmax(e, axis=-1)
    alpha = jnp.where(m, alpha, 0.0)
    o = jnp.einsum('bhxy,byhd->bxhd', alpha, vh).reshape(batch_size, num_seeds, dim) + q
    o = o + jax.nn.relu(o @ Wo + bo)
    return o.reshape(batch_size * num_seeds, dim)


# ----------------------------- main ------------------------------------------

if __name__ == "__main__":
    dim, num_heads, num_seeds = 32, 4, 4

    key = jax.random.PRNGKey(0)
    keys = jax.random.split(key, 12)

    # Parameters (deterministic synthetic init; shapes follow the module __init__).
    # Linear weights are stored [in, out] so matmuls are plain x @ W + b.
    xavier_bound = math.sqrt(6.0 / (num_seeds + dim))
    S = jax.random.uniform(keys[1], (num_seeds, dim), jnp.float32,
                           -xavier_bound, xavier_bound)
    lin_bound = 1.0 / math.sqrt(dim)
    def linear(kw, kb):
        W = jax.random.uniform(kw, (dim, dim), jnp.float32, -lin_bound, lin_bound)
        b = jax.random.uniform(kb, (dim,), jnp.float32, -lin_bound, lin_bound)
        return W, b
    Wq, bq = linear(keys[2], keys[3])
    Wk, bk = linear(keys[4], keys[5])
    Wv, bv = linear(keys[6], keys[7])
    Wo, bo = linear(keys[8], keys[9])
    params = (S, Wq, bq, Wk, bk, Wv, bv, Wo, bo)

    def run_case(lengths, xkey, param_dtype, rtol, atol):
        n = sum(lengths)
        batch_size, max_len = len(lengths), max(lengths)
        x_in = jax.random.normal(xkey, (n, dim), jnp.float32)
        batch = jnp.asarray(sum(([b] * l for b, l in enumerate(lengths)), []),
                            jnp.int32)
        fwd = jax.jit(functools.partial(
            pma_forward, dim=dim, num_heads=num_heads, num_seeds=num_seeds,
            batch_size=batch_size, max_len=max_len, param_dtype=param_dtype))
        out = jax.block_until_ready(fwd(x_in, batch, params))
        ref = pma_reference(x_in, batch, params, dim=dim, num_heads=num_heads,
                            num_seeds=num_seeds, batch_size=batch_size,
                            max_len=max_len)
        assert out.shape == (batch_size * num_seeds, dim)
        assert jnp.allclose(out, ref, rtol=rtol, atol=atol), (
            f"mismatch vs reference ({jnp.dtype(param_dtype).name})")
        return out

    # Small case (grid=1, single sub-block): exact-structure check in f32
    # (tolerance covers the approximate EUP reciprocal and the bias foldings),
    # then the production bf16-operand config (looser tolerance: bf16 rounding
    # of matmul operands vs. the all-f32 reference).
    run_case([5, 8], keys[0], jnp.float32, 2e-3, 2e-3)
    run_case([5, 8], keys[0], jnp.bfloat16, 5e-2, 5e-2)

    # Larger case exercising batch padding, grid=2 and multiple sub-blocks.
    lengths2 = [3, 7, 12, 5, 1, 9, 11, 4, 8, 6, 2, 10, 12, 7, 3, 5, 9, 1, 6, 8]
    run_case(lengths2, keys[10], jnp.float32, 2e-3, 2e-3)
    run_case(lengths2, keys[10], jnp.bfloat16, 5e-2, 5e-2)

    print("KERNEL_OK")
</pallas_src>

<mosaic_0001>
module attributes {stable_mosaic.version = 11 : i64} {
  func.func @_pma_kernel(%arg0: i32, %arg1: memref<8x8x33xf32, #tpu.memory_space<vmem>>, %arg2: memref<33x256xf32, #tpu.memory_space<vmem>>, %arg3: memref<1x128xf32, #tpu.memory_space<vmem>>, %arg4: memref<128x128xf32, #tpu.memory_space<vmem>>, %arg5: memref<1x128xf32, #tpu.memory_space<vmem>>, %arg6: memref<8x128xf32, #tpu.memory_space<vmem>>, %arg7: memref<8x128xf32, #tpu.memory_space<vmem>>) attributes {dimension_semantics = [#tpu.dimension_semantics<parallel>], iteration_bounds = array<i64: 1>, scalar_prefetch = 0 : i64, scratch_operands = 1 : i64, tpu.core_type = #tpu.core_type<tc>, window_params = [{transform_indices = @transform_0, window_bounds = array<i64: 8, 8, 33>}, {pipeline_mode = #tpu.pipeline_mode<synchronous>, transform_indices = @transform_1, window_bounds = array<i64: 33, 256>}, {pipeline_mode = #tpu.pipeline_mode<synchronous>, transform_indices = @transform_2, window_bounds = array<i64: 1, 128>}, {pipeline_mode = #tpu.pipeline_mode<synchronous>, transform_indices = @transform_3, window_bounds = array<i64: 128, 128>}, {pipeline_mode = #tpu.pipeline_mode<synchronous>, transform_indices = @transform_4, window_bounds = array<i64: 1, 128>}, {transform_indices = @transform_5, window_bounds = array<i64: 8, 128>}]} {
    %c0 = arith.constant 0 : index
    %c0_0 = arith.constant 0 : index
    %0 = vector.load %arg3[%c0, %c0_0] : memref<1x128xf32, #tpu.memory_space<vmem>>, vector<1x128xf32>
    %c0_1 = arith.constant 0 : index
    %c0_2 = arith.constant 0 : index
    %c0_3 = arith.constant 0 : index
    %1 = vector.load %arg1[%c0_1, %c0_2, %c0_3] : memref<8x8x33xf32, #tpu.memory_space<vmem>>, vector<8x8x33xf32>
    %2 = vector.shape_cast %1 : vector<8x8x33xf32> to vector<64x33xf32>
    %c0_4 = arith.constant 0 : index
    %c0_5 = arith.constant 0 : index
    %3 = vector.load %arg2[%c0_4, %c0_5] : memref<33x256xf32, #tpu.memory_space<vmem>>, vector<33x256xf32>
    %cst = arith.constant dense<0.000000e+00> : vector<64x256xf32>
    %4 = tpu.matmul %2, %3, %cst {dimension_numbers = #tpu.dot_dimension_numbers<[1], [0], [0], [1], [0, 0, 1, 1], [], []>} : vector<64x33xf32>, vector<33x256xf32>, vector<64x256xf32> -> vector<64x256xf32>
    %5 = vector.extract_strided_slice %4 {offsets = [0, 0], sizes = [64, 128], strides = [1, 1]} : vector<64x256xf32> to vector<64x128xf32>
    %6 = vector.shape_cast %5 : vector<64x128xf32> to vector<8x8x128xf32>
    %7 = vector.extract_strided_slice %4 {offsets = [0, 128], sizes = [64, 128], strides = [1, 1]} : vector<64x256xf32> to vector<64x128xf32>
    %8 = vector.shape_cast %7 : vector<64x128xf32> to vector<8x8x128xf32>
    %cst_6 = arith.constant dense<0xFF800000> : vector<8x128xf32>
    %9 = vector.multi_reduction <maximumf>, %8, %cst_6 [1] : vector<8x8x128xf32> to vector<8x128xf32>
    %10 = vector.shape_cast %9 : vector<8x128xf32> to vector<8x1x128xf32>
    %11 = vector.broadcast %10 : vector<8x1x128xf32> to vector<8x8x128xf32>
    %12 = arith.subf %8, %11 : vector<8x8x128xf32>
    %13 = math.exp %12 : vector<8x8x128xf32>
    %cst_7 = arith.constant dense<0.000000e+00> : vector<8x128xf32>
    %14 = vector.multi_reduction <add>, %13, %cst_7 [1] : vector<8x8x128xf32> to vector<8x128xf32>
    %15 = arith.mulf %13, %6 : vector<8x8x128xf32>
    %cst_8 = arith.constant dense<0.000000e+00> : vector<8x128xf32>
    %16 = vector.multi_reduction <add>, %15, %cst_8 [1] : vector<8x8x128xf32> to vector<8x128xf32>
    %17 = tpu.reciprocal %14 {approx = true} : vector<8x128xf32> -> vector<8x128xf32>
    %18 = arith.mulf %16, %17 : vector<8x128xf32>
    %19 = vector.broadcast %0 : vector<1x128xf32> to vector<8x128xf32>
    %20 = arith.addf %18, %19 : vector<8x128xf32>
    %c0_9 = arith.constant 0 : index
    %c0_10 = arith.constant 0 : index
    %21 = vector.load %arg7[%c0_9, %c0_10] : memref<8x128xf32, #tpu.memory_space<vmem>>, vector<8x128xf32>
    tpu.vector_store %arg7[%c0_9, %c0_10], %20 {strides = array<i32>} : memref<8x128xf32, #tpu.memory_space<vmem>>, vector<8x128xf32>,
    %c0_11 = arith.constant 0 : index
    %c0_12 = arith.constant 0 : index
    %22 = vector.load %arg7[%c0_11, %c0_12] : memref<8x128xf32, #tpu.memory_space<vmem>>, vector<8x128xf32>
    %c0_13 = arith.constant 0 : index
    %c0_14 = arith.constant 0 : index
    %23 = vector.load %arg4[%c0_13, %c0_14] : memref<128x128xf32, #tpu.memory_space<vmem>>, vector<128x128xf32>
    %cst_15 = arith.constant dense<0.000000e+00> : vector<8x128xf32>
    %24 = tpu.matmul %22, %23, %cst_15 {dimension_numbers = #tpu.dot_dimension_numbers<[1], [0], [0], [1], [0, 0, 1, 1], [], []>} : vector<8x128xf32>, vector<128x128xf32>, vector<8x128xf32> -> vector<8x128xf32>
    %c0_16 = arith.constant 0 : index
    %c0_17 = arith.constant 0 : index
    %25 = vector.load %arg5[%c0_16, %c0_17] : memref<1x128xf32, #tpu.memory_space<vmem>>, vector<1x128xf32>
    %26 = vector.broadcast %25 : vector<1x128xf32> to vector<8x128xf32>
    %27 = arith.addf %24, %26 : vector<8x128xf32>
    %cst_18 = arith.constant 0.000000e+00 : f32
    %28 = vector.broadcast %cst_18 : f32 to vector<8x128xf32>
    %29 = arith.maximumf %27, %28 : vector<8x128xf32>
    %30 = arith.addf %22, %29 : vector<8x128xf32>
    %c0_19 = arith.constant 0 : index
    %c0_20 = arith.constant 0 : index
    %31 = vector.load %arg6[%c0_19, %c0_20] : memref<8x128xf32, #tpu.memory_space<vmem>>, vector<8x128xf32>
    tpu.vector_store %arg6[%c0_19, %c0_20], %30 {strides = array<i32>} : memref<8x128xf32, #tpu.memory_space<vmem>>, vector<8x128xf32>,
    return
  }
  func.func @transform_0(%arg0: i32) -> (i32, i32, i32) {
    %c0_i32 = arith.constant 0 : i32
    %c0_i32_0 = arith.constant 0 : i32
    %c0_i32_1 = arith.constant 0 : i32
    return %arg0, %c0_i32, %c0_i32_0 : i32, i32, i32
  }
  func.func @transform_1(%arg0: i32) -> (i32, i32) {
    %c0_i32 = arith.constant 0 : i32
    %c0_i32_0 = arith.constant 0 : i32
    %c0_i32_1 = arith.constant 0 : i32
    return %c0_i32, %c0_i32_0 : i32, i32
  }
  func.func @transform_2(%arg0: i32) -> (i32, i32) {
    %c0_i32 = arith.constant 0 : i32
    %c0_i32_0 = arith.constant 0 : i32
    %c0_i32_1 = arith.constant 0 : i32
    return %c0_i32, %c0_i32_0 : i32, i32
  }
  func.func @transform_3(%arg0: i32) -> (i32, i32) {
    %c0_i32 = arith.constant 0 : i32
    %c0_i32_0 = arith.constant 0 : i32
    %c0_i32_1 = arith.constant 0 : i32
    return %c0_i32, %c0_i32_0 : i32, i32
  }
  func.func @transform_4(%arg0: i32) -> (i32, i32) {
    %c0_i32 = arith.constant 0 : i32
    %c0_i32_0 = arith.constant 0 : i32
    %c0_i32_1 = arith.constant 0 : i32
    return %c0_i32, %c0_i32_0 : i32, i32
  }
  func.func @transform_5(%arg0: i32) -> (i32, i32) {
    %c0_i32 = arith.constant 0 : i32
    %c0_i32_0 = arith.constant 0 : i32
    return %arg0, %c0_i32 : i32, i32
  }
}

</mosaic_0001>

<bundles_post_ra>
// kernel: tile.19
= control target key start
LH: loop header
LB: loop body
LE: loop exit
PB: predicated region body
PF: predicated region fallthrough
CT: control target
= control target key end

     0   :  { %vm132_vm0 = vcmask 1047556   ;;  %s338_s15 = smov 96   ;;  %s339_s30 = smov 64   ;;  %vm134_vm1 = vcmask 261120   ;;  %vm171_vm2 = vcmask 1048320   ;;  %vm214_vm3 = vcmask 785920   ;;  %s535_s0 = inlined_call_operand.vmem [shape: f32[32,4,32], index: 0, kind: input, shape index: {}]   ;;  %s536_s1 = inlined_call_operand.vmem [shape: f32[32,128], index: 1, kind: output, shape index: {}]  }
   0x1   :  { %v316_v0 = vld [vmem:[%s535_s0 + $0x1c] sm:$0xf]  ;;  %v317_v1 = vld [vmem:[%s535_s0 + $0x18] sm:$0xf]  ;;  %v318_v2 = vld [vmem:[%s535_s0 + $0x14] sm:$0xf] }
   0x2   :  { %103 = vst [vmem:[#allocation0 + $0x38] sm:$0xf] %v316_v0  ;;  %v319_v3 = vld [vmem:[%s535_s0 + $0x10] sm:$0xf]  ;;  %v320_v4 = vld [vmem:[%s535_s0 + $0xc] sm:$0xf] }
   0x3   :  { %107 = vst [vmem:[#allocation0 + $0x30] sm:$0xf] %v317_v1  ;;  %v321_v5 = vld [vmem:[%s535_s0 + $0x8] sm:$0xf]  ;;  %v322_v6 = vld [vmem:[%s535_s0 + $0x4] sm:$0xf] }
   0x4   :  { %111 = vst [vmem:[#allocation0 + $0x28] sm:$0xf] %v318_v2  ;;  %v128_v7 = vld [vmem:[%s535_s0] sm:$0xf]  ;;  %v300_v8 = vld [vmem:[%s535_s0 + $0x5c] sm:$0xf] }
   0x5   :  { %115 = vst [vmem:[#allocation0 + $0x20] sm:$0xf] %v319_v3  ;;  %v301_v9 = vld [vmem:[%s535_s0 + $0x58] sm:$0xf]  ;;  %v302_v10 = vld [vmem:[%s535_s0 + $0x54] sm:$0xf] }
   0x6   :  { %119 = vst [vmem:[#allocation0 + $0x18] sm:$0xf] %v320_v4  ;;  %v303_v11 = vld [vmem:[%s535_s0 + $0x50] sm:$0xf]  ;;  %v304_v12 = vld [vmem:[%s535_s0 + $0x4c] sm:$0xf] }
   0x7   :  { %123 = vst [vmem:[#allocation0 + $0x10] sm:$0xf] %v321_v5  ;;  %v305_v13 = vld [vmem:[%s535_s0 + $0x48] sm:$0xf]  ;;  %v306_v14 = vld [vmem:[%s535_s0 + $0x44] sm:$0xf] }
   0x8   :  { %127 = vst [vmem:[#allocation0 + $0x8] sm:$0xf] %v322_v6  ;;  %v307_v15 = vld [vmem:[%s535_s0 + $0x40] sm:$0xf]  ;;  %v308_v17 = vld [vmem:[%s535_s0 + $0x3c] sm:$0xf] }
   0x9   :  { %129 = vst [vmem:[#allocation0] sm:$0xf] %v128_v7  ;;  %v309_v18 = vld [vmem:[%s535_s0 + $0x38] sm:$0xf]  ;;  %v310_v21 = vld [vmem:[%s535_s0 + $0x34] sm:$0xf] }
   0xa   :  { %39 = vst [vmem:[#allocation0 + $0xb8] sm:$0xf] %v300_v8  ;;  %v311_v22 = vld [vmem:[%s535_s0 + $0x30] sm:$0xf]  ;;  %v312_v23 = vld [vmem:[%s535_s0 + $0x2c] sm:$0xf] }
   0xb   :  { %43 = vst [vmem:[#allocation0 + $0xb0] sm:$0xf] %v301_v9  ;;  %v313_v24 = vld [vmem:[%s535_s0 + $0x28] sm:$0xf]  ;;  %v314_v25 = vld [vmem:[%s535_s0 + $0x24] sm:$0xf] }
   0xc   :  { %47 = vst [vmem:[#allocation0 + $0xa8] sm:$0xf] %v302_v10  ;;  %v166_v16 = vld [vmem:[#allocation0 + $0x3] ss:$8 sm:$0xf0]   ;;  %vm257_vm4 = vcmask 523520  }
   0xd   :  { %51 = vst [vmem:[#allocation0 + $0xa0] sm:$0xf] %v303_v11  ;;  %v315_v26 = vld [vmem:[%s535_s0 + $0x20] sm:$0xf]  ;;  %v292_v30 = vld [vmem:[%s535_s0 + $0x7c] sm:$0xf] }
   0xe   :  { %55 = vst [vmem:[#allocation0 + $0x98] sm:$0xf] %v304_v12  ;;  %v209_v29 = vld [vmem:[#allocation0 + $0x2] ss:$8 sm:$0xf0]  }
   0xf   :  { %59 = vst [vmem:[#allocation0 + $0x90] sm:$0xf] %v305_v13  ;;  %v293_v31 = vld [vmem:[%s535_s0 + $0x78] sm:$0xf]  ;;  %v294_v35 = vld [vmem:[%s535_s0 + $0x74] sm:$0xf] }
  0x10   :  { %v164_v19 = vld [vmem:[#allocation0 + $0x3] ss:$8 sm:$0xf]   ;;  %63 = vst [vmem:[#allocation0 + $0x88] sm:$0xf] %v306_v14 }
  0x11   :  { %v168_v20 = vsel %vm132_vm0, %v166_v16, %v164_v19  ;;  %67 = vst [vmem:[#allocation0 + $0x80] sm:$0xf] %v307_v15  ;;  %v207_v27 = vld [vmem:[#allocation0 + $0x2] ss:$8 sm:$0xf]  }
  0x12   :  { %169 = vrot.lane.b32.xlu0 %v168_v20, %s338_s15  ;;  %71 = vst [vmem:[#allocation0 + $0x78] sm:$0xf] %v308_v17  ;;  %v211_v32 = vsel %vm132_vm0, %v209_v29, %v207_v27  ;;  %v295_v36 = vld [vmem:[%s535_s0 + $0x70] sm:$0xf]  ;;  %v296_v37 = vld [vmem:[%s535_s0 + $0x6c] sm:$0xf] }
  0x13   :  { %75 = vst [vmem:[#allocation0 + $0x70] sm:$0xf] %v309_v18  ;;  %212 = vrot.lane.b32.xlu2 %v211_v32, %s339_s30  ;;  %v297_v38 = vld [vmem:[%s535_s0 + $0x68] sm:$0xf]  ;;  %v298_v39 = vld [vmem:[%s535_s0 + $0x64] sm:$0xf] }
  0x14   :  { %79 = vst [vmem:[#allocation0 + $0x68] sm:$0xf] %v310_v21  ;;  %v187_v28 = vld [vmem:[#allocation0 + $0x83] ss:$8 sm:$0xf0]  }
  0x15   :  { %83 = vst [vmem:[#allocation0 + $0x60] sm:$0xf] %v311_v22  ;;  %v299_v40 = vld [vmem:[%s535_s0 + $0x60] sm:$0xf]  ;;  %s340_s0 = smov 32  }
  0x16   :  { %87 = vst [vmem:[#allocation0 + $0x58] sm:$0xf] %v312_v23  ;;  %v230_v48 = vld [vmem:[#allocation0 + $0x82] ss:$8 sm:$0xf0]  }
  0x17   :  { %91 = vst [vmem:[#allocation0 + $0x50] sm:$0xf] %v313_v24  ;;  %v250_v49 = vld [vmem:[#allocation0 + $0x1] ss:$8 sm:$0xf]  }
  0x18   :  { %v185_v33 = vld [vmem:[#allocation0 + $0x83] ss:$8 sm:$0xf]   ;;  %95 = vst [vmem:[#allocation0 + $0x48] sm:$0xf] %v314_v25 }
  0x19   :  { %v189_v34 = vsel %vm132_vm0, %v187_v28, %v185_v33  ;;  %99 = vst [vmem:[#allocation0 + $0x40] sm:$0xf] %v315_v26  ;;  %v228_v47 = vld [vmem:[#allocation0 + $0x82] ss:$8 sm:$0xf]  }
  0x1a   :  { %190 = vrot.lane.b32.xlu1 %v189_v34, %s338_s15  ;;  %7 = vst [vmem:[#allocation0 + $0xf8] sm:$0xf] %v292_v30  ;;  %v252_v51 = vld [vmem:[#allocation0 + $0x1] ss:$8 sm:$0xf0]   ;;  %v232_v52 = vsel %vm132_vm0, %v230_v48, %v228_v47 }
  0x1b   :  { %11 = vst [vmem:[#allocation0 + $0xf0] sm:$0xf] %v293_v31  ;;  %v254_v55 = vsel %vm132_vm0, %v252_v51, %v250_v49  ;;  %v271_v1 = vld [vmem:[#allocation0 + $0x81] ss:$8 sm:$0xf]  }
  0x1c   :  { %15 = vst [vmem:[#allocation0 + $0xe8] sm:$0xf] %v294_v35  ;;  %v176_v41 = vld [vmem:[#allocation0 + $0x43] ss:$8 sm:$0xf0]  }
  0x1d   :  { %19 = vst [vmem:[#allocation0 + $0xe0] sm:$0xf] %v295_v36  ;;  %v219_v42 = vld [vmem:[#allocation0 + $0x42] ss:$8 sm:$0xf0]  }
  0x1e   :  { %23 = vst [vmem:[#allocation0 + $0xd8] sm:$0xf] %v296_v37  ;;  %v262_v57 = vld [vmem:[#allocation0 + $0x41] ss:$8 sm:$0xf0]  }
  0x1f   :  { %27 = vst [vmem:[#allocation0 + $0xd0] sm:$0xf] %v297_v38  ;;  %v273_v2 = vld [vmem:[#allocation0 + $0x81] ss:$8 sm:$0xf0]  }
  0x20   :  { %v174_v43 = vld [vmem:[#allocation0 + $0x43] ss:$8 sm:$0xf]   ;;  %31 = vst [vmem:[#allocation0 + $0xc8] sm:$0xf] %v298_v39  ;;  %v275_v3 = vsel %vm132_vm0, %v273_v2, %v271_v1 }
  0x21   :  { %v178_v44 = vsel %vm132_vm0, %v176_v41, %v174_v43  ;;  %35 = vst [vmem:[#allocation0 + $0xc0] sm:$0xf] %v299_v40  ;;  %v217_v45 = vld [vmem:[#allocation0 + $0x42] ss:$8 sm:$0xf]  }
  0x22   :  { %179 = vrot.lane.b32.xlu0 %v178_v44, %s338_s15  ;;  %v221_v46 = vsel %vm132_vm0, %v219_v42, %v217_v45  ;;  %v260_v56 = vld [vmem:[#allocation0 + $0x41] ss:$8 sm:$0xf]   ;;  %v130_v4 = vld [vmem:[#allocation0] ss:$8 sm:$0xf]  }
  0x23   :  { %222 = vrot.lane.b32.xlu2 %v221_v46, %s339_s30  ;;  %v264_v63 = vsel %vm132_vm0, %v262_v57, %v260_v56  ;;  %v131_v5 = vld [vmem:[#allocation0] ss:$8 sm:$0xf0]  }
  0x24   :  { %v198_v50 = vld [vmem:[#allocation0 + $0xc3] ss:$8 sm:$0xf0]   ;;  %v241_v59 = vld [vmem:[#allocation0 + $0xc2] ss:$8 sm:$0xf0]   ;;  %v133_v6 = vsel %vm132_vm0, %v131_v5, %v130_v4 }
  0x25   :  { %v284_v61 = vld [vmem:[#allocation0 + $0xc1] ss:$8 sm:$0xf0]   ;;  %135 = vst.msk [vmem:[%s536_s1] sm:$0xff] %vm134_vm1, %v133_v6  }
  0x26   :  { %v146_v7 = vld [vmem:[#allocation0 + $0x80] ss:$8 sm:$0xf]  }
  0x27   :  { %v148_v8 = vld [vmem:[#allocation0 + $0x80] ss:$8 sm:$0xf0]  }
  0x28   :  { %v196_v53 = vld [vmem:[#allocation0 + $0xc3] ss:$8 sm:$0xf]   ;;  %v239_v58 = vld [vmem:[#allocation0 + $0xc2] ss:$8 sm:$0xf]   ;;  %v150_v9 = vsel %vm132_vm0, %v148_v8, %v146_v7 }
  0x29   :  { %v200_v54 = vsel %vm132_vm0, %v198_v50, %v196_v53  ;;  %v282_v60 = vld [vmem:[#allocation0 + $0xc1] ss:$8 sm:$0xf]   ;;  %v243_v62 = vsel %vm132_vm0, %v241_v59, %v239_v58  ;;  %324 = vst.msk [vmem:[%s536_s1 + $0x10] sm:$0xff] %vm134_vm1, %v150_v9  }
  0x2a   :  { %201 = vrot.lane.b32.xlu1 %v200_v54, %s338_s15  ;;  %233 = vrot.lane.b32.xlu0 %v232_v52, %s339_s30  ;;  %v286_v0 = vsel %vm132_vm0, %v284_v61, %v282_v60  ;;  %v137_v11 = vld [vmem:[#allocation0 + $0x40] ss:$8 sm:$0xf]  }
  0x2b   :  { %255 = vrot.lane.b32.xlu2 %v254_v55, %s340_s0  ;;  %v139_v12 = vld [vmem:[#allocation0 + $0x40] ss:$8 sm:$0xf0]  }
  0x2c   :  { %v141_v13 = vsel %vm132_vm0, %v139_v12, %v137_v11  ;;  %v155_v14 = vld [vmem:[#allocation0 + $0xc0] ss:$8 sm:$0xf]  }
  0x2d   :  { %323 = vst.msk [vmem:[%s536_s1 + $0x8] sm:$0xff] %vm134_vm1, %v141_v13   ;;  %v157_v15 = vld [vmem:[#allocation0 + $0xc0] ss:$8 sm:$0xf0]  }
  0x2e   :  { %v159_v16 = vsel %vm132_vm0, %v157_v15, %v155_v14 }
  0x2f   :  { %325 = vst.msk [vmem:[%s536_s1 + $0x18] sm:$0xff] %vm134_vm1, %v159_v16  }
  0x32   :  { %244 = vrot.lane.b32.xlu1 %v243_v62, %s339_s30  ;;  %265 = vrot.lane.b32.xlu0 %v264_v63, %s340_s0 }
  0x33   :  { %287 = vrot.lane.b32.xlu2 %v286_v0, %s340_s0 }
  0x3a   :  { %276 = vrot.lane.b32.xlu1 %v275_v3, %s340_s0 }
  0x6d   :  { %v213_v10 = vpop.permute.xlu2 %212  }
  0x7d   :  { %v223_v17 = vpop.permute.xlu2 %222  }
  0x84   :  { %v170_v18 = vpop.permute.xlu0 %169  }
  0x85   :  { %172 = vst.msk [vmem:[%s536_s1] sm:$0xff] %vm171_vm2, %v170_v18   ;;  %v256_v19 = vpop.permute.xlu2 %255  }
  0x86   :  { %215 = vst.msk [vmem:[%s536_s1] sm:$0xff] %vm214_vm3, %v213_v10  }
  0x87   :  { %258 = vst.msk [vmem:[%s536_s1] sm:$0xff] %vm257_vm4, %v256_v19  }
  0x8c   :  { %v191_v20 = vpop.permute.xlu1 %190  }
  0x8d   :  { %327 = vst.msk [vmem:[%s536_s1 + $0x10] sm:$0xff] %vm171_vm2, %v191_v20   ;;  %v288_v21 = vpop.permute.xlu2 %287  }
  0x94   :  { %v180_v22 = vpop.permute.xlu0 %179  }
  0x95   :  { %326 = vst.msk [vmem:[%s536_s1 + $0x8] sm:$0xff] %vm171_vm2, %v180_v22  }
  0x96   :  { %329 = vst.msk [vmem:[%s536_s1 + $0x8] sm:$0xff] %vm214_vm3, %v223_v17  }
  0x9c   :  { %v202_v23 = vpop.permute.xlu1 %201   ;;  %v234_v24 = vpop.permute.xlu0 %233  }
  0x9d   :  { %328 = vst.msk [vmem:[%s536_s1 + $0x18] sm:$0xff] %vm171_vm2, %v202_v23  }
  0x9e   :  { %330 = vst.msk [vmem:[%s536_s1 + $0x10] sm:$0xff] %vm214_vm3, %v234_v24  }
  0xa4   :  { %v245_v25 = vpop.permute.xlu1 %244   ;;  %v266_v26 = vpop.permute.xlu0 %265  }
  0xa5   :  { %331 = vst.msk [vmem:[%s536_s1 + $0x18] sm:$0xff] %vm214_vm3, %v245_v25  }
  0xa6   :  { %332 = vst.msk [vmem:[%s536_s1 + $0x8] sm:$0xff] %vm257_vm4, %v266_v26  }
  0xa7   :  { %334 = vst.msk [vmem:[%s536_s1 + $0x18] sm:$0xff] %vm257_vm4, %v288_v21  }
  0xac   :  { %v277_v27 = vpop.permute.xlu1 %276  }
  0xad   :  { %333 = vst.msk [vmem:[%s536_s1 + $0x10] sm:$0xff] %vm257_vm4, %v277_v27  }

// kernel: tile.28
= control target key start
LH: loop header
LB: loop body
LE: loop exit
PB: predicated region body
PF: predicated region fallthrough
CT: control target
= control target key end

     0   :  { %s22_s0 = inlined_call_operand.vmem [shape: f32[32], index: 0, kind: input, shape index: {}]   ;;  %s23_s1 = inlined_call_operand.vmem [shape: f32[4,32], index: 1, kind: output, shape index: {}]  }
   0x1   :  { %v4_v0 = vld [vmem:[%s22_s0] ss:$0 sm:$0xff] }
   0x2   :  { %5 = vst [vmem:[%s23_s1] sm:$0xf] %v4_v0 }

// kernel: pma_forward.1
= control target key start
LH: loop header
LB: loop body
LE: loop exit
PB: predicated region body
PF: predicated region fallthrough
CT: control target
= control target key end

     0   :  { %vm64_vm0 = vcmask 1040384   ;;  %vm39_vm1 = vcmask 269312   ;;  %vm365_vm2 = vcmask 1041409   ;;  %vm368_vm3 = vcmask 1042434   ;;  %s665_s1 = inlined_call_operand.vmem [shape: f32[33,256], index: 1, kind: input, shape index: {}]   ;;  %s666_s0 = inlined_call_operand.vmem [shape: f32[8,8,33], index: 0, kind: input, shape index: {}]   ;;  %s667_s2 = inlined_call_operand.vmem [shape: f32[1,128], index: 2, kind: input, shape index: {}]   ;;  %s668_s4 = inlined_call_operand.vmem [shape: f32[1,128], index: 4, kind: input, shape index: {}]   ;;  %s669_s3 = inlined_call_operand.vmem [shape: f32[128,128], index: 3, kind: input, shape index: {}]   ;;  %s670_s5 = inlined_call_operand.vmem [shape: f32[8,128], index: 5, kind: output, shape index: {}]  }
   0x1   :  { %v38_v0 = vld [vmem:[%s665_s1 + $0x48] sm:$0x1]  ;;  %v36_v1 = vld [vmem:[%s665_s1 + $0x38] sm:$0xff]  ;;  %v37_v3 = vld [vmem:[%s665_s1 + $0x40] sm:$0x1]  ;;  %vm371_vm4 = vcmask 1043459  }
   0x2   :  { %444 = vmatpush.msk.msra.mxu1 %vm64_vm0, %v38_v0  ;;  %458 = vmatpush.msk.msra.mxu3 %vm64_vm0, %v38_v0  ;;  %v34_v2 = vld [vmem:[%s665_s1 + $0x28] sm:$0xff]  ;;  %v35_v4 = vld [vmem:[%s665_s1 + $0x30] sm:$0xff]  ;;  %v32_v5 = vld [vmem:[%s665_s1 + $0x18] sm:$0xff]  ;;  %vm374_vm5 = vcmask 1044484   ;;  %vm377_vm6 = vcmask 1045509   ;;  %vm380_vm7 = vcmask 1046534  }
   0x3   :  { %435 = vmatpush.msk.msra.mxu0 %vm64_vm0, %v37_v3  ;;  %453 = vmatpush.msk.msra.mxu2 %vm64_vm0, %v37_v3  ;;  %v33_v6 = vld [vmem:[%s665_s1 + $0x20] sm:$0xff]  ;;  %v30_v7 = vld [vmem:[%s665_s1 + $0x8] sm:$0xff]  ;;  %v31_v10 = vld [vmem:[%s665_s1 + $0x10] sm:$0xff]  ;;  %vm383_vm8 = vcmask 1047559  }
   0x4   :  { %124 = vmatpush.msra.mxu1 %v36_v1  ;;  %459 = vmatpush.msra.mxu3 %v36_v1  ;;  %v21_v8 = vld [vmem:[%s666_s0] sm:$0xff]  ;;  %v26_v9 = vld [vmem:[%s666_s0 + $0x28] sm:$0xff]  ;;  %v27_v13 = vld [vmem:[%s666_s0 + $0x30] sm:$0xff] }
   0x5   :  { %83 = vmatpush.msra.mxu0 %v35_v4  ;;  %454 = vmatpush.msra.mxu2 %v35_v4  ;;  %v29_v11 = vld [vmem:[%s665_s1] sm:$0xff]  ;;  %v22_v12 = vld [vmem:[%s666_s0 + $0x8] sm:$0xff]  ;;  %v23_v14 = vld [vmem:[%s666_s0 + $0x10] sm:$0xff] }
   0x6   :  { %125 = vmatpush.msra.mxu1 %v34_v2  ;;  %460 = vmatpush.msra.mxu3 %v34_v2  ;;  %v28_v15 = vld [vmem:[%s666_s0 + $0x38] sm:$0xff]  ;;  %v25_v17 = vld [vmem:[%s666_s0 + $0x20] sm:$0xff] }
   0x7   :  { %84 = vmatpush.msra.mxu0 %v33_v6  ;;  %455 = vmatpush.msra.mxu2 %v33_v6  ;;  %v24_v16 = vld [vmem:[%s666_s0 + $0x18] sm:$0xff] }
   0x8   :  { %126 = vmatpush.msra.mxu1 %v32_v5  ;;  %461 = vmatpush.msra.mxu3 %v32_v5 }
   0x9   :  { %85 = vmatpush.msra.mxu0 %v31_v10  ;;  %456 = vmatpush.msra.mxu2 %v31_v10 }
   0xa   :  { %127 = vmatpush.msra.mxu1 %v30_v7  ;;  %462 = vmatpush.msra.mxu3 %v30_v7 }
   0xb   :  { %445 = vmatmul.msk.f32.vlgmr.msra.gmra.mxu1 %vm39_vm1, %v21_v8  ;;  %450 = vmatmul.msk.f32.vlgmr.msra.gmra.mxu3 %vm39_vm1, %v26_v9 }
   0xc   :  { %86 = vmatpush.msra.mxu0 %v29_v11  ;;  %457 = vmatpush.msra.mxu2 %v29_v11 }
   0xd   :  { %436 = vmatmul.msk.f32.vlgmr.msra.gmra.mxu0 %vm39_vm1, %v21_v8  ;;  %441 = vmatmul.msk.f32.vlgmr.msra.gmra.mxu2 %vm39_vm1, %v26_v9  ;;  %v403_v9 = vld [vmem:[%s669_s3 + $0x78] sm:$0xff] }
   0xe   :  { %408 = vmatpush.msrb.mxu2 %v403_v9 }
  0x13   :  { %446 = vmatmul.msk.f32.gmra.mxu1 %vm39_vm1, %v22_v12  ;;  %451 = vmatmul.msk.f32.gmra.mxu3 %vm39_vm1, %v27_v13 }
  0x15   :  { %437 = vmatmul.msk.f32.gmra.mxu0 %vm39_vm1, %v22_v12  ;;  %442 = vmatmul.msk.f32.gmra.mxu2 %vm39_vm1, %v27_v13 }
  0x1b   :  { %447 = vmatmul.msk.f32.gmra.mxu1 %vm39_vm1, %v23_v14  ;;  %452 = vmatmul.msk.f32.gmra.mxu3 %vm39_vm1, %v28_v15 }
  0x1d   :  { %438 = vmatmul.msk.f32.gmra.mxu0 %vm39_vm1, %v23_v14  ;;  %443 = vmatmul.msk.f32.gmra.mxu2 %vm39_vm1, %v28_v15  ;;  %v402_v14 = vld [vmem:[%s669_s3 + $0x70] sm:$0xff] }
  0x1e   :  { %409 = vmatpush.msrb.mxu2 %v402_v14 }
  0x23   :  { %448 = vmatmul.msk.f32.gmra.mxu1 %vm39_vm1, %v24_v16 }
  0x25   :  { %439 = vmatmul.msk.f32.gmra.mxu0 %vm39_vm1, %v24_v16 }
  0x2b   :  { %449 = vmatmul.msk.f32.gmra.mxu1 %vm39_vm1, %v25_v17 }
  0x2d   :  { %440 = vmatmul.msk.f32.gmra.mxu0 %vm39_vm1, %v25_v17 }
  0x88   :  { %v129_v18 = vpop.f32.mrf.mxu1 }
  0x89   :  { %v153_v19 = vrot.slane %v129_v18, 4 }
  0x8a   :  { %v597_v43 = vpop.f32.mrf.mxu0 }
  0x8b   :  { %v154_v20 = vmax.f32 %v129_v18, %v153_v19  ;;  %v401_v19 = vld [vmem:[%s669_s3 + $0x68] sm:$0xff] }
  0x8c   :  { %410 = vmatpush.msrb.mxu2 %v401_v19  ;;  %v392_v19 = vld [vmem:[%s669_s3 + $0x20] sm:$0xff] }
  0x8d   :  { %v155_v21 = vrot.slane %v154_v20, 2 }
  0x8e   :  { %v144_v22 = vpop.f32.mrf.mxu3 }
  0x8f   :  { %v156_v23 = vmax.f32 %v154_v20, %v155_v21  ;;  %v183_v24 = vrot.slane %v144_v22, 4 }
  0x90   :  { %v132_v25 = vpop.f32.mrf.mxu1  ;;  %v599_v8 = vpop.f32.mrf.mxu2 }
  0x91   :  { %v184_v26 = vmax.f32 %v144_v22, %v183_v24  ;;  %v159_v27 = vrot.slane %v132_v25, 4  ;;  %v157_v28 = vrot.slane %v156_v23, 1  ;;  %v400_v24 = vld [vmem:[%s669_s3 + $0x60] sm:$0xff] }
  0x92   :  { %v91_v4 = vpop.f32.mrf.mxu0  ;;  %411 = vmatpush.msrb.mxu2 %v400_v24 }
  0x93   :  { %v185_v29 = vrot.slane %v184_v26, 2  ;;  %v160_v30 = vmax.f32 %v132_v25, %v159_v27  ;;  %v158_v34 = vmax.f32 %v156_v23, %v157_v28 }
  0x95   :  { %v186_v31 = vmax.f32 %v184_v26, %v185_v29  ;;  %v161_v32 = vrot.slane %v160_v30, 2  ;;  %v201_v44 = vsub.f32 %v129_v18, %v158_v34 }
  0x96   :  { %v147_v33 = vpop.f32.mrf.mxu3 }
  0x97   :  { %v187_v35 = vrot.slane %v186_v31, 1  ;;  %v162_v36 = vmax.f32 %v160_v30, %v161_v32  ;;  %v189_v37 = vrot.slane %v147_v33, 4  ;;  %v209_v53 = vmul.f32 1.442695, %v201_v44  ;;  %v397_v44 = vld [vmem:[%s669_s3 + $0x48] sm:$0xff] }
  0x98   :  { %v135_v38 = vpop.f32.mrf.mxu1 }
  0x99   :  { %v163_v39 = vrot.slane %v162_v36, 1  ;;  %v190_v40 = vmax.f32 %v147_v33, %v189_v37  ;;  %v188_v41 = vmax.f32 %v186_v31, %v187_v35  ;;  %v165_v42 = vrot.slane %v135_v38, 4  ;;  %v399_v31 = vld [vmem:[%s669_s3 + $0x58] sm:$0xff]  ;;  %v398_v37 = vld [vmem:[%s669_s3 + $0x50] sm:$0xff] }
  0x9a   :  { %465 = vpow2.f32 %v209_v53  ;;  %v94_v30 = vpop.f32.mrf.mxu0  ;;  %412 = vmatpush.msrb.mxu2 %v399_v31 }
  0x9b   :  { %v164_v45 = vmax.f32 %v162_v36, %v163_v39  ;;  %v191_v46 = vrot.slane %v190_v40, 2  ;;  %v166_v47 = vmax.f32 %v135_v38, %v165_v42  ;;  %v206_v50 = vsub.f32 %v144_v22, %v188_v41  ;;  %v106_v36 = vpop.f32.mrf.mxu2 }
  0x9c   :  { %413 = vmatpush.msrb.mxu2 %v398_v37  ;;  %v389_v37 = vld [vmem:[%s669_s3 + $0x8] sm:$0xff] }
  0x9d   :  { %v202_v48 = vsub.f32 %v132_v25, %v164_v45  ;;  %v192_v49 = vmax.f32 %v190_v40, %v191_v46  ;;  %v167_v51 = vrot.slane %v166_v47, 2  ;;  %v219_v62 = vmul.f32 1.442695, %v206_v50 }
  0x9e   :  { %v150_v52 = vpop.f32.mrf.mxu3  ;;  %414 = vmatpush.msrb.mxu2 %v397_v44 }
  0x9f   :  { %v193_v54 = vrot.slane %v192_v49, 1  ;;  %v195_v55 = vrot.slane %v150_v52, 4  ;;  %v211_v56 = vmul.f32 1.442695, %v202_v48  ;;  %v168_v57 = vmax.f32 %v166_v47, %v167_v51 }
  0xa0   :  { %v138_v58 = vpop.f32.mrf.mxu1  ;;  %v466_v15 = vpop.eup %465 }
  0xa1   :  { %v194_v59 = vmax.f32 %v192_v49, %v193_v54  ;;  %v196_v60 = vmax.f32 %v150_v52, %v195_v55  ;;  %v171_v61 = vrot.slane %v138_v58, 4  ;;  %v169_v63 = vrot.slane %v168_v57, 1  ;;  %v396_v49 = vld [vmem:[%s669_s3 + $0x40] sm:$0xff] }
  0xa2   :  { %467 = vpow2.f32 %v211_v56  ;;  %v225_v25 = vrot.slane %v466_v15, 4  ;;  %415 = vmatpush.msrb.mxu2 %v396_v49 }
  0xa3   :  { %v207_v0 = vsub.f32 %v147_v33, %v194_v59  ;;  %v197_v1 = vrot.slane %v196_v60, 2  ;;  %v172_v2 = vmax.f32 %v138_v58, %v171_v61  ;;  %v170_v3 = vmax.f32 %v168_v57, %v169_v63 }
  0xa4   :  { %469 = vpow2.f32 %v219_v62  ;;  %v226_v40 = vadd.f32 %v466_v15, %v225_v25 }
  0xa5   :  { %v198_v5 = vmax.f32 %v196_v60, %v197_v1  ;;  %v173_v6 = vrot.slane %v172_v2, 2  ;;  %v203_v7 = vsub.f32 %v135_v38, %v170_v3  ;;  %v221_v10 = vmul.f32 1.442695, %v207_v0 }
  0xa6   :  { %v227_v51 = vrot.slane %v226_v40, 2 }
  0xa7   :  { %v199_v11 = vrot.slane %v198_v5, 1  ;;  %v174_v12 = vmax.f32 %v172_v2, %v173_v6  ;;  %v213_v13 = vmul.f32 1.442695, %v203_v7  ;;  %v394_v2 = vld [vmem:[%s669_s3 + $0x30] sm:$0xff] }
  0xa8   :  { %v468_v18 = vpop.eup %467  ;;  %v610_v22 = vpop.f32.mrf.mxu1  ;;  %v228_v3 = vadd.f32 %v227_v51, %v226_v40 }
  0xa9   :  { %v200_v16 = vmax.f32 %v198_v5, %v199_v11  ;;  %v175_v17 = vrot.slane %v174_v12, 1  ;;  %471 = vpow2.f32 %v213_v13  ;;  %v231_v26 = vrot.slane %v468_v18, 4  ;;  %v393_v11 = vld [vmem:[%s669_s3 + $0x28] sm:$0xff] }
  0xaa   :  { %473 = vpow2.f32 %v221_v10  ;;  %v470_v23 = vpop.eup %469  ;;  %v177_v29 = vrot.slane %v610_v22, 4  ;;  %v274_v46 = vmul.f32 %v468_v18, %v91_v4 }
  0xab   :  { %v208_v20 = vsub.f32 %v150_v52, %v200_v16  ;;  %v176_v21 = vmax.f32 %v174_v12, %v175_v17  ;;  %v255_v32 = vrot.slane %v470_v23, 4  ;;  %v232_v41 = vadd.f32 %v468_v18, %v231_v26 }
  0xac   :  { %v178_v35 = vmax.f32 %v610_v22, %v177_v29  ;;  %v273_v52 = vmul.f32 %v466_v15, %v597_v43  ;;  %v278_v61 = vmul.f32 %v470_v23, %v599_v8  ;;  %v287_v62 = vrot.slane %v274_v46, 4  ;;  %v97_v43 = vpop.f32.mrf.mxu0  ;;  %v109_v8 = vpop.f32.mrf.mxu2 }
  0xad   :  { %v223_v27 = vmul.f32 1.442695, %v208_v20  ;;  %v204_v28 = vsub.f32 %v138_v58, %v176_v21  ;;  %v256_v45 = vadd.f32 %v470_v23, %v255_v32  ;;  %v233_v53 = vrot.slane %v232_v41, 2  ;;  %v395_v58 = vld [vmem:[%s669_s3 + $0x38] sm:$0xff] }
  0xae   :  { %v179_v42 = vrot.slane %v178_v35, 2  ;;  %416 = vmatpush.msrb.mxu2 %v395_v58  ;;  %v281_v4 = vrot.slane %v273_v52, 4  ;;  %v311_v13 = vrot.slane %v278_v61, 4  ;;  %v288_v14 = vadd.f32 %v287_v62, %v274_v46  ;;  %v391_v20 = vld [vmem:[%s669_s3 + $0x18] sm:$0xff] }
  0xaf   :  { %475 = vpow2.f32 %v223_v27  ;;  %v215_v33 = vmul.f32 1.442695, %v204_v28  ;;  %v472_v34 = vpop.eup %471  ;;  %v257_v60 = vrot.slane %v256_v45, 2  ;;  %v234_v5 = vadd.f32 %v233_v53, %v232_v41  ;;  %v390_v28 = vld [vmem:[%s669_s3 + $0x10] sm:$0xff] }
  0xb0   :  { %v474_v38 = vpop.eup %473  ;;  %v237_v39 = vrot.slane %v472_v34, 4  ;;  %v180_v48 = vmax.f32 %v178_v35, %v179_v42  ;;  %v275_v57 = vmul.f32 %v472_v34, %v94_v30  ;;  %417 = vmatpush.msrb.mxu2 %v394_v2  ;;  %v229_v21 = vrot.slane %v228_v3, 1 }
  0xb1   :  { %477 = vpow2.f32 %v215_v33  ;;  %v261_v47 = vrot.slane %v474_v38, 4  ;;  %v258_v12 = vadd.f32 %v257_v60, %v256_v45  ;;  %v279_v18 = vmul.f32 %v474_v38, %v106_v36 }
  0xb2   :  { %v238_v54 = vadd.f32 %v472_v34, %v237_v39  ;;  %v181_v56 = vrot.slane %v180_v48, 1  ;;  %v293_v10 = vrot.slane %v275_v57, 4  ;;  %418 = vmatpush.msrb.mxu2 %v393_v11  ;;  %v235_v23 = vrot.slane %v234_v5, 1 }
  0xb3   :  { %v262_v1 = vadd.f32 %v474_v38, %v261_v47  ;;  %v259_v29 = vrot.slane %v258_v12, 1  ;;  %v312_v30 = vadd.f32 %v311_v13, %v278_v61  ;;  %v289_v31 = vrot.slane %v288_v14, 2  ;;  %v388_v47 = vld [vmem:[%s669_s3] sm:$0xff] }
  0xb4   :  { %v239_v63 = vrot.slane %v238_v54, 2  ;;  %v182_v0 = vmax.f32 %v180_v48, %v181_v56  ;;  %419 = vmatpush.msrb.mxu2 %v392_v19  ;;  %v294_v25 = vadd.f32 %v293_v10, %v275_v57  ;;  %v317_v34 = vrot.slane %v279_v18, 4  ;;  %v100_v46 = vpop.f32.mrf.mxu0 }
  0xb5   :  { %v476_v50 = vpop.eup %475  ;;  %v263_v17 = vrot.slane %v262_v1, 2  ;;  %v230_v38 = vadd.f32 %v229_v21, %v228_v3  ;;  %v236_v41 = vadd.f32 %v235_v23, %v234_v5  ;;  %v260_v48 = vadd.f32 %v259_v29, %v258_v12 }
  0xb6   :  { %v267_v55 = vrot.slane %v476_v50, 4  ;;  %v205_v9 = vsub.f32 %v610_v22, %v182_v0  ;;  %v240_v15 = vadd.f32 %v239_v63, %v238_v54  ;;  %v282_v22 = vadd.f32 %v281_v4, %v273_v52  ;;  %420 = vmatpush.msrb.mxu2 %v391_v20 }
  0xb7   :  { %v478_v59 = vpop.eup %477  ;;  %v280_v24 = vmul.f32 %v476_v50, %v109_v8  ;;  %v264_v33 = vadd.f32 %v263_v17, %v262_v1  ;;  %v295_v42 = vrot.slane %v294_v25, 2  ;;  %v313_v49 = vrot.slane %v312_v30, 2 }
  0xb8   :  { %v268_v6 = vadd.f32 %v476_v50, %v267_v55  ;;  %v243_v7 = vrot.slane %v478_v59, 4  ;;  %v217_v16 = vmul.f32 1.442695, %v205_v9  ;;  %v241_v32 = vrot.slane %v240_v15, 1  ;;  %421 = vmatpush.msrb.mxu2 %v390_v28 }
  0xb9   :  { %v276_v36 = vmul.f32 %v478_v59, %v97_v43  ;;  %v283_v39 = vrot.slane %v282_v22, 2  ;;  %v323_v40 = vrot.slane %v280_v24, 4  ;;  %v290_v53 = vadd.f32 %v289_v31, %v288_v14 }
  0xba   :  { %479 = vpow2.f32 %v217_v16  ;;  %v269_v26 = vrot.slane %v268_v6, 2  ;;  %v244_v27 = vadd.f32 %v478_v59, %v243_v7  ;;  %v242_v50 = vadd.f32 %v241_v32, %v240_v15  ;;  %422 = vmatpush.msrb.mxu2 %v389_v37 }
  0xbb   :  { %v299_v51 = vrot.slane %v276_v36, 4  ;;  %v265_v54 = vrot.slane %v264_v33, 1  ;;  %v318_v55 = vadd.f32 %v317_v34, %v279_v18  ;;  %v324_v58 = vadd.f32 %v323_v40, %v280_v24 }
  0xbc   :  { %v245_v35 = vrot.slane %v244_v27, 2  ;;  %v270_v44 = vadd.f32 %v269_v26, %v268_v6  ;;  %423 = vmatpush.msrb.mxu2 %v388_v47  ;;  %481 = vrcp.f32 %v236_v41  ;;  %v296_v61 = vadd.f32 %v295_v42, %v294_v25 }
  0xbd   :  { %v300_v59 = vadd.f32 %v299_v51, %v276_v36  ;;  %483 = vrcp.f32 %v242_v50  ;;  %v291_v2 = vrot.slane %v290_v53, 1  ;;  %v266_v3 = vadd.f32 %v265_v54, %v264_v33  ;;  %v463_v33 = vld [vmem:[%s667_s2] ss:$0 sm:$0xff] }
  0xbe   :  { %v246_v45 = vadd.f32 %v245_v35, %v244_v27  ;;  %v271_v62 = vrot.slane %v270_v44, 1  ;;  %v319_v4 = vrot.slane %v318_v55, 2  ;;  %v325_v5 = vrot.slane %v324_v58, 2 }
  0xbf   :  { %v301_v1 = vrot.slane %v300_v59, 2  ;;  %v284_v10 = vadd.f32 %v283_v39, %v282_v22  ;;  %v297_v8 = vrot.slane %v296_v61, 1  ;;  %v314_v12 = vadd.f32 %v313_v49, %v312_v30 }
  0xc0   :  { %v480_v52 = vpop.eup %479  ;;  %v247_v56 = vrot.slane %v246_v45, 1  ;;  %v272_v11 = vadd.f32 %v271_v62, %v270_v44  ;;  %v320_v17 = vadd.f32 %v319_v4, %v318_v55  ;;  %v292_v19 = vadd.f32 %v291_v2, %v290_v53 }
  0xc1   :  { %v249_v57 = vrot.slane %v480_v52, 4  ;;  %v277_v60 = vmul.f32 %v480_v52, %v100_v46  ;;  %v302_v6 = vadd.f32 %v301_v1, %v300_v59  ;;  %v326_v20 = vadd.f32 %v325_v5, %v324_v58 }
  0xc2   :  { %v248_v63 = vadd.f32 %v247_v56, %v246_v45  ;;  %v482_v16 = vpop.eup %481  ;;  %v285_v24 = vrot.slane %v284_v10, 1  ;;  %v298_v25 = vadd.f32 %v297_v8, %v296_v61  ;;  %v315_v26 = vrot.slane %v314_v12, 1 }
  0xc3   :  { %v250_v0 = vadd.f32 %v480_v52, %v249_v57  ;;  %v305_v43 = vrot.slane %v277_v60, 4  ;;  %v303_v13 = vrot.slane %v302_v6, 1  ;;  %v484_v18 = vpop.eup %483  ;;  %v338_v27 = vmul.f32 %v482_v16, %v292_v19 }
  0xc4   :  { %485 = vrcp.f32 %v248_v63  ;;  %v321_v31 = vrot.slane %v320_v17, 1  ;;  %v339_v32 = vmul.f32 %v484_v18, %v298_v25  ;;  %v327_v34 = vrot.slane %v326_v20, 1 }
  0xc5   :  { %v251_v7 = vrot.slane %v250_v0, 2  ;;  %v306_v9 = vadd.f32 %v305_v43, %v277_v60  ;;  %487 = vrcp.f32 %v230_v38  ;;  %v304_v28 = vadd.f32 %v303_v13, %v302_v6 }
  0xc6   :  { %489 = vrcp.f32 %v260_v48  ;;  %v286_v39 = vadd.f32 %v285_v24, %v284_v10  ;;  %v316_v40 = vadd.f32 %v315_v26, %v314_v12  ;;  %v349_v41 = vadd.f32 %v463_v33, %v338_v27  ;;  %v464_v10 = vld [vmem:[%s668_s4] ss:$0 sm:$0xff] }
  0xc7   :  { %v252_v14 = vadd.f32 %v251_v7, %v250_v0  ;;  %v307_v15 = vrot.slane %v306_v9, 2  ;;  %491 = vrcp.f32 %v266_v3  ;;  %v322_v44 = vadd.f32 %v321_v31, %v320_v17 }
  0xc8   :  { %493 = vrcp.f32 %v272_v11  ;;  %v350_v45 = vadd.f32 %v463_v33, %v339_v32  ;;  %v328_v48 = vadd.f32 %v327_v34, %v326_v20  ;;  %v364_v53 = vrot.slane %v349_v41, 7 }
  0xc9   :  { %v253_v21 = vrot.slane %v252_v14, 1  ;;  %v308_v22 = vadd.f32 %v307_v15, %v306_v9 }
  0xca   :  { %v486_v23 = vpop.eup %485  ;;  %v367_v55 = vrot.slane %v350_v45, 6 }
  0xcb   :  { %v254_v29 = vadd.f32 %v253_v21, %v252_v14  ;;  %v488_v30 = vpop.eup %487  ;;  %v340_v35 = vmul.f32 %v486_v23, %v304_v28  ;;  %v309_v37 = vrot.slane %v308_v22, 1 }
  0xcc   :  { %v490_v36 = vpop.eup %489  ;;  %v337_v46 = vmul.f32 %v488_v30, %v286_v39 }
  0xcd   :  { %495 = vrcp.f32 %v254_v29  ;;  %v492_v38 = vpop.eup %491  ;;  %v342_v47 = vmul.f32 %v490_v36, %v316_v40  ;;  %v351_v49 = vadd.f32 %v463_v33, %v340_v35  ;;  %v310_v51 = vadd.f32 %v309_v37, %v308_v22 }
  0xce   :  { %v494_v42 = vpop.eup %493  ;;  %v343_v50 = vmul.f32 %v492_v38, %v322_v44  ;;  %v348_v57 = vadd.f32 %v463_v33, %v337_v46 }
  0xcf   :  { %v344_v54 = vmul.f32 %v494_v42, %v328_v48  ;;  %v353_v58 = vadd.f32 %v463_v33, %v342_v47  ;;  %v370_v59 = vrot.slane %v351_v49, 5 }
  0xd0   :  { %v354_v61 = vadd.f32 %v463_v33, %v343_v50  ;;  %v366_v63 = vsel %vm365_vm2, %v364_v53, %v348_v57 }
  0xd1   :  { %v355_v62 = vadd.f32 %v463_v33, %v344_v54  ;;  %v369_v1 = vsel %vm368_vm3, %v367_v55, %v366_v63  ;;  %v376_v2 = vrot.slane %v353_v58, 3 }
  0xd2   :  { %v372_v43 = vsel %vm371_vm4, %v370_v59, %v369_v1  ;;  %v379_v4 = vrot.slane %v354_v61, 2 }
  0xd3   :  { %v496_v52 = vpop.eup %495  ;;  %v382_v6 = vrot.slane %v355_v62, 1 }
  0xd4   :  { %v341_v56 = vmul.f32 %v496_v52, %v310_v51 }
  0xd6   :  { %v352_v60 = vadd.f32 %v463_v33, %v341_v56 }
  0xd8   :  { %v373_v0 = vrot.slane %v352_v60, 4 }
  0xda   :  { %v375_v3 = vsel %vm374_vm5, %v373_v0, %v372_v43 }
  0xdb   :  { %v378_v5 = vsel %vm377_vm6, %v376_v2, %v375_v3 }
  0xdc   :  { %v381_v7 = vsel %vm380_vm7, %v379_v4, %v378_v5 }
  0xdd   :  { %v384_v9 = vsel %vm383_vm8, %v382_v6, %v381_v7 }
  0xde   :  { %424 = vmatmul.f32.vlgmr.msrb.gmra.mxu2 %v384_v9 }
 0x161   :  { %v425_v8 = vpop.f32.mrf.mxu2 }
 0x162   :  { %v426_v11 = vadd.f32 %v464_v10, %v425_v8 }
 0x164   :  { %v428_v12 = vmax.f32 %v426_v11, 0.0 }
 0x166   :  { %v429_v13 = vadd.f32 %v428_v12, %v384_v9 }
 0x168   :  { %430 = vst [vmem:[%s670_s5] sm:$0xff] %v429_v13 }

</bundles_post_ra>
